<compile_context>
chip_gen: v6e
topology: v6e:2x2x1
jax: 0.10.0
libtpu: 0.0.40
codegen_flags: <defaults>
</compile_context>

<pallas_src>
import math
from functools import partial

import jax
import jax.numpy as jnp
from jax.experimental import pallas as pl
from jax.experimental.pallas import tpu as pltpu


def attention_kernel(x_ref, wqkv_ref, bqkv_ref, wo_ref, bo_ref, out_ref, *,
                     n_heads, d_head, inv_scale):
    S = x_ref.shape[1]
    Hdh = n_heads * d_head

    x = x_ref[0]                                                   # (S, D)

    # Fused QKV projection: one wide matmul instead of 3*H tiny ones.
    qkv = (jnp.dot(x, wqkv_ref[...], preferred_element_type=jnp.float32)
           + bqkv_ref[...])                                        # (S, 3*H*dh)

    # Causal mask built in-kernel: query index >= key index.
    row = jax.lax.broadcasted_iota(jnp.int32, (S, S), 0)
    col = jax.lax.broadcasted_iota(jnp.int32, (S, S), 1)
    causal = row >= col
    ignore = jnp.float32(-100000.0)

    z_heads = []
    for h in range(n_heads):                                       # static unroll (small H)
        lo = h * d_head
        q = qkv[:, lo:lo + d_head] * inv_scale                     # scale folded into q
        k = qkv[:, Hdh + lo:Hdh + lo + d_head]
        v = qkv[:, 2 * Hdh + lo:2 * Hdh + lo + d_head]

        s = jnp.dot(q, k.T, preferred_element_type=jnp.float32)    # (S, S)
        s = jnp.where(causal, s, ignore)

        m = jnp.max(s, axis=-1, keepdims=True)
        e = jnp.exp(s - m)
        l = jnp.sum(e, axis=-1, keepdims=True)                     # (S, 1)

        zh = jnp.dot(e, v, preferred_element_type=jnp.float32)     # (S, dh), unnormalized
        zh = zh * pl.reciprocal(l, approx=True)                    # normalize z, not attn
        z_heads.append(zh)

    z = jnp.concatenate(z_heads, axis=-1)                          # (S, H*dh)

    # Output projection: single matmul + single store.
    out = (jnp.dot(z, wo_ref[...], preferred_element_type=jnp.float32)
           + bo_ref[...])                                          # (S, D)
    out_ref[0] = out.astype(out_ref.dtype)


def attention_forward(x, W_Q, W_K, W_V, W_O, b_Q, b_K, b_V, b_O, attn_scale):
    """x: [B,S,D] f32. W_{Q,K,V}: [H,dh,D]. W_O: [H,D,dh]. Returns [B,S,D]."""
    B, S, D = x.shape
    H, dh, _ = W_Q.shape
    Hdh = H * dh

    # Weight prep (layout plumbing done once in the wrapper, not per grid step):
    #   [H, dh, D] -> [D, H*dh]; concatenated into one (D, 3*H*dh) QKV matrix.
    def flat(W):
        return jnp.transpose(W, (2, 0, 1)).reshape(D, Hdh)

    W_qkv = jnp.concatenate([flat(W_Q), flat(W_K), flat(W_V)], axis=1)   # (D, 3*H*dh)
    b_qkv = jnp.concatenate([b_Q.reshape(1, Hdh), b_K.reshape(1, Hdh),
                             b_V.reshape(1, Hdh)], axis=1)               # (1, 3*H*dh)
    #   W_O: [H, D, dh] -> [H*dh, D] so z_flat @ W_O_flat == einsum('idh,qih->qd').
    W_O_flat = jnp.transpose(W_O, (0, 2, 1)).reshape(Hdh, D)             # (H*dh, D)
    b_O2 = b_O.reshape(1, D)

    const = lambda shape: pl.BlockSpec(shape, lambda b: tuple(0 for _ in shape))

    return pl.pallas_call(
        partial(attention_kernel, n_heads=H, d_head=dh,
                inv_scale=float(1.0 / attn_scale)),
        out_shape=jax.ShapeDtypeStruct((B, S, D), jnp.float32),
        grid_spec=pltpu.PrefetchScalarGridSpec(
            num_scalar_prefetch=0,
            grid=(B,),
            in_specs=[
                pl.BlockSpec((1, S, D), lambda b: (b, 0, 0)),   # x (per-batch block)
                const((D, 3 * Hdh)),                            # fused W_QKV
                const((1, 3 * Hdh)),                            # fused b_QKV
                const((Hdh, D)),                                # W_O (pre-transposed, flat)
                const((1, D)),                                  # b_O
            ],
            out_specs=pl.BlockSpec((1, S, D), lambda b: (b, 0, 0)),
        ),
        compiler_params=pltpu.CompilerParams(
            dimension_semantics=("parallel",)),
    )(x, W_qkv, b_qkv, W_O_flat, b_O2)


def attention_reference(x, W_Q, W_K, W_V, W_O, b_Q, b_K, b_V, b_O, attn_scale):
    """Pure-JAX mirror of the PyTorch forward (causal, no cache)."""
    S = x.shape[1]
    mask = jnp.tril(jnp.ones((S, S), dtype=bool))
    q = jnp.einsum('ihm,bpm->bpih', W_Q, x) + b_Q
    k = jnp.einsum('ihm,bpm->bpih', W_K, x) + b_K
    v = jnp.einsum('ihm,bpm->bpih', W_V, x) + b_V
    scores = jnp.einsum('bpih,bqih->bipq', q, k) / attn_scale
    scores = jnp.where(mask[None, None, :, :], scores, jnp.float32(-100000.0))
    attn = jax.nn.softmax(scores, axis=-1)
    z = jnp.einsum('bpih,biqp->bqih', v, attn)
    out = jnp.einsum('idh,bqih->bqd', W_O, z) + b_O
    return out


if __name__ == "__main__":
    # Small config consistent with the module: n_heads=4, d_head=8, d_model=32,
    # n_ctx=seq=8, batch=2, attention_dir='causal', use_attn_scale=True.
    B, S, D, H, dh = 2, 8, 32, 4, 8
    attn_scale = math.sqrt(dh)

    key = jax.random.PRNGKey(0)
    ks = jax.random.split(key, 9)
    W_Q = jax.random.normal(ks[0], (H, dh, D), jnp.float32) * 0.1
    W_K = jax.random.normal(ks[1], (H, dh, D), jnp.float32) * 0.1
    W_V = jax.random.normal(ks[2], (H, dh, D), jnp.float32) * 0.1
    W_O = jax.random.normal(ks[3], (H, D, dh), jnp.float32) * 0.1
    b_Q = jax.random.normal(ks[4], (H, dh), jnp.float32) * 0.01
    b_K = jax.random.normal(ks[5], (H, dh), jnp.float32) * 0.01
    b_V = jax.random.normal(ks[6], (H, dh), jnp.float32) * 0.01
    b_O = jax.random.normal(ks[7], (D,), jnp.float32) * 0.01
    x = jax.random.normal(ks[8], (B, S, D), jnp.float32)

    out = attention_forward(x, W_Q, W_K, W_V, W_O, b_Q, b_K, b_V, b_O,
                            attn_scale)
    out = jax.block_until_ready(out)

    ref = attention_reference(x, W_Q, W_K, W_V, W_O, b_Q, b_K, b_V, b_O,
                              attn_scale)
    assert out.shape == (B, S, D)
    assert jnp.allclose(out, ref, atol=2e-3, rtol=2e-3), (
        float(jnp.max(jnp.abs(out - ref))))

    print("KERNEL_OK")
</pallas_src>

<mosaic_0001>
module attributes {stable_mosaic.version = 11 : i64} {
  func.func @attention_kernel(%arg0: i32, %arg1: memref<1x8x32xf32, #tpu.memory_space<vmem>>, %arg2: memref<32x96xf32, #tpu.memory_space<vmem>>, %arg3: memref<1x96xf32, #tpu.memory_space<vmem>>, %arg4: memref<32x32xf32, #tpu.memory_space<vmem>>, %arg5: memref<1x32xf32, #tpu.memory_space<vmem>>, %arg6: memref<1x8x32xf32, #tpu.memory_space<vmem>>) attributes {dimension_semantics = [#tpu.dimension_semantics<parallel>], iteration_bounds = array<i64: 2>, scalar_prefetch = 0 : i64, scratch_operands = 0 : i64, tpu.core_type = #tpu.core_type<tc>, window_params = [{transform_indices = @transform_0, window_bounds = array<i64: 1, 8, 32>}, {pipeline_mode = #tpu.pipeline_mode<synchronous>, transform_indices = @transform_1, window_bounds = array<i64: 32, 96>}, {pipeline_mode = #tpu.pipeline_mode<synchronous>, transform_indices = @transform_2, window_bounds = array<i64: 1, 96>}, {pipeline_mode = #tpu.pipeline_mode<synchronous>, transform_indices = @transform_3, window_bounds = array<i64: 32, 32>}, {pipeline_mode = #tpu.pipeline_mode<synchronous>, transform_indices = @transform_4, window_bounds = array<i64: 1, 32>}, {transform_indices = @transform_5, window_bounds = array<i64: 1, 8, 32>}]} {
    %c0 = arith.constant 0 : index
    %c0_0 = arith.constant 0 : index
    %c0_1 = arith.constant 0 : index
    %0 = vector.load %arg1[%c0, %c0_0, %c0_1] : memref<1x8x32xf32, #tpu.memory_space<vmem>>, vector<1x8x32xf32>
    %1 = vector.shape_cast %0 : vector<1x8x32xf32> to vector<8x32xf32>
    %c0_2 = arith.constant 0 : index
    %c0_3 = arith.constant 0 : index
    %2 = vector.load %arg2[%c0_2, %c0_3] : memref<32x96xf32, #tpu.memory_space<vmem>>, vector<32x96xf32>
    %cst = arith.constant dense<0.000000e+00> : vector<8x96xf32>
    %3 = tpu.matmul %1, %2, %cst {dimension_numbers = #tpu.dot_dimension_numbers<[1], [0], [0], [1], [0, 0, 1, 1], [], []>} : vector<8x32xf32>, vector<32x96xf32>, vector<8x96xf32> -> vector<8x96xf32>
    %c0_4 = arith.constant 0 : index
    %c0_5 = arith.constant 0 : index
    %4 = vector.load %arg3[%c0_4, %c0_5] : memref<1x96xf32, #tpu.memory_space<vmem>>, vector<1x96xf32>
    %5 = vector.broadcast %4 : vector<1x96xf32> to vector<8x96xf32>
    %6 = arith.addf %3, %5 : vector<8x96xf32>
    %7 = tpu.iota {dimensions = array<i32: 0>} : vector<8x8xi32>
    %8 = tpu.iota {dimensions = array<i32: 1>} : vector<8x8xi32>
    %9 = arith.cmpi sge, %7, %8 : vector<8x8xi32>
    %10 = vector.extract_strided_slice %6 {offsets = [0, 0], sizes = [8, 8], strides = [1, 1]} : vector<8x96xf32> to vector<8x8xf32>
    %cst_6 = arith.constant 0.353553385 : f32
    %11 = vector.broadcast %cst_6 : f32 to vector<8x8xf32>
    %12 = arith.mulf %10, %11 : vector<8x8xf32>
    %13 = vector.extract_strided_slice %6 {offsets = [0, 32], sizes = [8, 8], strides = [1, 1]} : vector<8x96xf32> to vector<8x8xf32>
    %14 = vector.extract_strided_slice %6 {offsets = [0, 64], sizes = [8, 8], strides = [1, 1]} : vector<8x96xf32> to vector<8x8xf32>
    %15 = tpu.transpose %13, [1, 0] : vector<8x8xf32> -> vector<8x8xf32>
    %cst_7 = arith.constant dense<0.000000e+00> : vector<8x8xf32>
    %16 = tpu.matmul %12, %15, %cst_7 {dimension_numbers = #tpu.dot_dimension_numbers<[1], [0], [0], [1], [0, 0, 1, 1], [], []>} : vector<8x8xf32>, vector<8x8xf32>, vector<8x8xf32> -> vector<8x8xf32>
    %cst_8 = arith.constant -1.000000e+05 : f32
    %17 = vector.broadcast %cst_8 : f32 to vector<8x8xf32>
    %18 = arith.select %9, %16, %17 : vector<8x8xi1>, vector<8x8xf32>
    %cst_9 = arith.constant dense<0xFF800000> : vector<8xf32>
    %19 = vector.multi_reduction <maximumf>, %18, %cst_9 [1] : vector<8x8xf32> to vector<8xf32>
    %20 = vector.shape_cast %19 : vector<8xf32> to vector<8x1xf32>
    %21 = vector.broadcast %20 : vector<8x1xf32> to vector<8x8xf32>
    %22 = arith.subf %18, %21 : vector<8x8xf32>
    %23 = math.exp %22 : vector<8x8xf32>
    %cst_10 = arith.constant dense<0.000000e+00> : vector<8xf32>
    %24 = vector.multi_reduction <add>, %23, %cst_10 [1] : vector<8x8xf32> to vector<8xf32>
    %25 = vector.shape_cast %24 : vector<8xf32> to vector<8x1xf32>
    %cst_11 = arith.constant dense<0.000000e+00> : vector<8x8xf32>
    %26 = tpu.matmul %23, %14, %cst_11 {dimension_numbers = #tpu.dot_dimension_numbers<[1], [0], [0], [1], [0, 0, 1, 1], [], []>} : vector<8x8xf32>, vector<8x8xf32>, vector<8x8xf32> -> vector<8x8xf32>
    %27 = tpu.reciprocal %25 {approx = true} : vector<8x1xf32> -> vector<8x1xf32>
    %28 = vector.broadcast %27 : vector<8x1xf32> to vector<8x8xf32>
    %29 = arith.mulf %26, %28 : vector<8x8xf32>
    %30 = vector.extract_strided_slice %6 {offsets = [0, 8], sizes = [8, 8], strides = [1, 1]} : vector<8x96xf32> to vector<8x8xf32>
    %cst_12 = arith.constant 0.353553385 : f32
    %31 = vector.broadcast %cst_12 : f32 to vector<8x8xf32>
    %32 = arith.mulf %30, %31 : vector<8x8xf32>
    %33 = vector.extract_strided_slice %6 {offsets = [0, 40], sizes = [8, 8], strides = [1, 1]} : vector<8x96xf32> to vector<8x8xf32>
    %34 = vector.extract_strided_slice %6 {offsets = [0, 72], sizes = [8, 8], strides = [1, 1]} : vector<8x96xf32> to vector<8x8xf32>
    %35 = tpu.transpose %33, [1, 0] : vector<8x8xf32> -> vector<8x8xf32>
    %cst_13 = arith.constant dense<0.000000e+00> : vector<8x8xf32>
    %36 = tpu.matmul %32, %35, %cst_13 {dimension_numbers = #tpu.dot_dimension_numbers<[1], [0], [0], [1], [0, 0, 1, 1], [], []>} : vector<8x8xf32>, vector<8x8xf32>, vector<8x8xf32> -> vector<8x8xf32>
    %cst_14 = arith.constant -1.000000e+05 : f32
    %37 = vector.broadcast %cst_14 : f32 to vector<8x8xf32>
    %38 = arith.select %9, %36, %37 : vector<8x8xi1>, vector<8x8xf32>
    %cst_15 = arith.constant dense<0xFF800000> : vector<8xf32>
    %39 = vector.multi_reduction <maximumf>, %38, %cst_15 [1] : vector<8x8xf32> to vector<8xf32>
    %40 = vector.shape_cast %39 : vector<8xf32> to vector<8x1xf32>
    %41 = vector.broadcast %40 : vector<8x1xf32> to vector<8x8xf32>
    %42 = arith.subf %38, %41 : vector<8x8xf32>
    %43 = math.exp %42 : vector<8x8xf32>
    %cst_16 = arith.constant dense<0.000000e+00> : vector<8xf32>
    %44 = vector.multi_reduction <add>, %43, %cst_16 [1] : vector<8x8xf32> to vector<8xf32>
    %45 = vector.shape_cast %44 : vector<8xf32> to vector<8x1xf32>
    %cst_17 = arith.constant dense<0.000000e+00> : vector<8x8xf32>
    %46 = tpu.matmul %43, %34, %cst_17 {dimension_numbers = #tpu.dot_dimension_numbers<[1], [0], [0], [1], [0, 0, 1, 1], [], []>} : vector<8x8xf32>, vector<8x8xf32>, vector<8x8xf32> -> vector<8x8xf32>
    %47 = tpu.reciprocal %45 {approx = true} : vector<8x1xf32> -> vector<8x1xf32>
    %48 = vector.broadcast %47 : vector<8x1xf32> to vector<8x8xf32>
    %49 = arith.mulf %46, %48 : vector<8x8xf32>
    %50 = vector.extract_strided_slice %6 {offsets = [0, 16], sizes = [8, 8], strides = [1, 1]} : vector<8x96xf32> to vector<8x8xf32>
    %cst_18 = arith.constant 0.353553385 : f32
    %51 = vector.broadcast %cst_18 : f32 to vector<8x8xf32>
    %52 = arith.mulf %50, %51 : vector<8x8xf32>
    %53 = vector.extract_strided_slice %6 {offsets = [0, 48], sizes = [8, 8], strides = [1, 1]} : vector<8x96xf32> to vector<8x8xf32>
    %54 = vector.extract_strided_slice %6 {offsets = [0, 80], sizes = [8, 8], strides = [1, 1]} : vector<8x96xf32> to vector<8x8xf32>
    %55 = tpu.transpose %53, [1, 0] : vector<8x8xf32> -> vector<8x8xf32>
    %cst_19 = arith.constant dense<0.000000e+00> : vector<8x8xf32>
    %56 = tpu.matmul %52, %55, %cst_19 {dimension_numbers = #tpu.dot_dimension_numbers<[1], [0], [0], [1], [0, 0, 1, 1], [], []>} : vector<8x8xf32>, vector<8x8xf32>, vector<8x8xf32> -> vector<8x8xf32>
    %cst_20 = arith.constant -1.000000e+05 : f32
    %57 = vector.broadcast %cst_20 : f32 to vector<8x8xf32>
    %58 = arith.select %9, %56, %57 : vector<8x8xi1>, vector<8x8xf32>
    %cst_21 = arith.constant dense<0xFF800000> : vector<8xf32>
    %59 = vector.multi_reduction <maximumf>, %58, %cst_21 [1] : vector<8x8xf32> to vector<8xf32>
    %60 = vector.shape_cast %59 : vector<8xf32> to vector<8x1xf32>
    %61 = vector.broadcast %60 : vector<8x1xf32> to vector<8x8xf32>
    %62 = arith.subf %58, %61 : vector<8x8xf32>
    %63 = math.exp %62 : vector<8x8xf32>
    %cst_22 = arith.constant dense<0.000000e+00> : vector<8xf32>
    %64 = vector.multi_reduction <add>, %63, %cst_22 [1] : vector<8x8xf32> to vector<8xf32>
    %65 = vector.shape_cast %64 : vector<8xf32> to vector<8x1xf32>
    %cst_23 = arith.constant dense<0.000000e+00> : vector<8x8xf32>
    %66 = tpu.matmul %63, %54, %cst_23 {dimension_numbers = #tpu.dot_dimension_numbers<[1], [0], [0], [1], [0, 0, 1, 1], [], []>} : vector<8x8xf32>, vector<8x8xf32>, vector<8x8xf32> -> vector<8x8xf32>
    %67 = tpu.reciprocal %65 {approx = true} : vector<8x1xf32> -> vector<8x1xf32>
    %68 = vector.broadcast %67 : vector<8x1xf32> to vector<8x8xf32>
    %69 = arith.mulf %66, %68 : vector<8x8xf32>
    %70 = vector.extract_strided_slice %6 {offsets = [0, 24], sizes = [8, 8], strides = [1, 1]} : vector<8x96xf32> to vector<8x8xf32>
    %cst_24 = arith.constant 0.353553385 : f32
    %71 = vector.broadcast %cst_24 : f32 to vector<8x8xf32>
    %72 = arith.mulf %70, %71 : vector<8x8xf32>
    %73 = vector.extract_strided_slice %6 {offsets = [0, 56], sizes = [8, 8], strides = [1, 1]} : vector<8x96xf32> to vector<8x8xf32>
    %74 = vector.extract_strided_slice %6 {offsets = [0, 88], sizes = [8, 8], strides = [1, 1]} : vector<8x96xf32> to vector<8x8xf32>
    %75 = tpu.transpose %73, [1, 0] : vector<8x8xf32> -> vector<8x8xf32>
    %cst_25 = arith.constant dense<0.000000e+00> : vector<8x8xf32>
    %76 = tpu.matmul %72, %75, %cst_25 {dimension_numbers = #tpu.dot_dimension_numbers<[1], [0], [0], [1], [0, 0, 1, 1], [], []>} : vector<8x8xf32>, vector<8x8xf32>, vector<8x8xf32> -> vector<8x8xf32>
    %cst_26 = arith.constant -1.000000e+05 : f32
    %77 = vector.broadcast %cst_26 : f32 to vector<8x8xf32>
    %78 = arith.select %9, %76, %77 : vector<8x8xi1>, vector<8x8xf32>
    %cst_27 = arith.constant dense<0xFF800000> : vector<8xf32>
    %79 = vector.multi_reduction <maximumf>, %78, %cst_27 [1] : vector<8x8xf32> to vector<8xf32>
    %80 = vector.shape_cast %79 : vector<8xf32> to vector<8x1xf32>
    %81 = vector.broadcast %80 : vector<8x1xf32> to vector<8x8xf32>
    %82 = arith.subf %78, %81 : vector<8x8xf32>
    %83 = math.exp %82 : vector<8x8xf32>
    %cst_28 = arith.constant dense<0.000000e+00> : vector<8xf32>
    %84 = vector.multi_reduction <add>, %83, %cst_28 [1] : vector<8x8xf32> to vector<8xf32>
    %85 = vector.shape_cast %84 : vector<8xf32> to vector<8x1xf32>
    %cst_29 = arith.constant dense<0.000000e+00> : vector<8x8xf32>
    %86 = tpu.matmul %83, %74, %cst_29 {dimension_numbers = #tpu.dot_dimension_numbers<[1], [0], [0], [1], [0, 0, 1, 1], [], []>} : vector<8x8xf32>, vector<8x8xf32>, vector<8x8xf32> -> vector<8x8xf32>
    %87 = tpu.reciprocal %85 {approx = true} : vector<8x1xf32> -> vector<8x1xf32>
    %88 = vector.broadcast %87 : vector<8x1xf32> to vector<8x8xf32>
    %89 = arith.mulf %86, %88 : vector<8x8xf32>
    %90 = tpu.concatenate %29, %49, %69, %89 in 1 : vector<8x8xf32>, vector<8x8xf32>, vector<8x8xf32>, vector<8x8xf32> -> vector<8x32xf32>
    %c0_30 = arith.constant 0 : index
    %c0_31 = arith.constant 0 : index
    %91 = vector.load %arg4[%c0_30, %c0_31] : memref<32x32xf32, #tpu.memory_space<vmem>>, vector<32x32xf32>
    %cst_32 = arith.constant dense<0.000000e+00> : vector<8x32xf32>
    %92 = tpu.matmul %90, %91, %cst_32 {dimension_numbers = #tpu.dot_dimension_numbers<[1], [0], [0], [1], [0, 0, 1, 1], [], []>} : vector<8x32xf32>, vector<32x32xf32>, vector<8x32xf32> -> vector<8x32xf32>
    %c0_33 = arith.constant 0 : index
    %c0_34 = arith.constant 0 : index
    %93 = vector.load %arg5[%c0_33, %c0_34] : memref<1x32xf32, #tpu.memory_space<vmem>>, vector<1x32xf32>
    %94 = vector.broadcast %93 : vector<1x32xf32> to vector<8x32xf32>
    %95 = arith.addf %92, %94 : vector<8x32xf32>
    %c0_35 = arith.constant 0 : index
    %c0_36 = arith.constant 0 : index
    %c0_37 = arith.constant 0 : index
    %96 = vector.load %arg6[%c0_35, %c0_36, %c0_37] : memref<1x8x32xf32, #tpu.memory_space<vmem>>, vector<1x8x32xf32>
    %97 = vector.shape_cast %96 : vector<1x8x32xf32> to vector<8x32xf32>
    %98 = vector.shape_cast %95 : vector<8x32xf32> to vector<1x8x32xf32>
    tpu.vector_store %arg6[%c0_35, %c0_36, %c0_37], %98 {strides = array<i32>} : memref<1x8x32xf32, #tpu.memory_space<vmem>>, vector<1x8x32xf32>,
    return
  }
  func.func @transform_0(%arg0: i32) -> (i32, i32, i32) {
    %c0_i32 = arith.constant 0 : i32
    %c0_i32_0 = arith.constant 0 : i32
    %c0_i32_1 = arith.constant 0 : i32
    return %arg0, %c0_i32, %c0_i32_0 : i32, i32, i32
  }
  func.func @transform_1(%arg0: i32) -> (i32, i32) {
    %c0_i32 = arith.constant 0 : i32
    %c0_i32_0 = arith.constant 0 : i32
    %c0_i32_1 = arith.constant 0 : i32
    return %c0_i32, %c0_i32_0 : i32, i32
  }
  func.func @transform_2(%arg0: i32) -> (i32, i32) {
    %c0_i32 = arith.constant 0 : i32
    %c0_i32_0 = arith.constant 0 : i32
    %c0_i32_1 = arith.constant 0 : i32
    return %c0_i32, %c0_i32_0 : i32, i32
  }
  func.func @transform_3(%arg0: i32) -> (i32, i32) {
    %c0_i32 = arith.constant 0 : i32
    %c0_i32_0 = arith.constant 0 : i32
    %c0_i32_1 = arith.constant 0 : i32
    return %c0_i32, %c0_i32_0 : i32, i32
  }
  func.func @transform_4(%arg0: i32) -> (i32, i32) {
    %c0_i32 = arith.constant 0 : i32
    %c0_i32_0 = arith.constant 0 : i32
    %c0_i32_1 = arith.constant 0 : i32
    return %c0_i32, %c0_i32_0 : i32, i32
  }
  func.func @transform_5(%arg0: i32) -> (i32, i32, i32) {
    %c0_i32 = arith.constant 0 : i32
    %c0_i32_0 = arith.constant 0 : i32
    %c0_i32_1 = arith.constant 0 : i32
    return %arg0, %c0_i32, %c0_i32_0 : i32, i32, i32
  }
}

</mosaic_0001>

<bundles_post_ra>
// kernel: tpu_custom_call.1
= control target key start
LH: loop header
LB: loop body
LE: loop exit
PB: predicated region body
PF: predicated region fallthrough
CT: control target
= control target key end

     0   :  { %10 = vsyncpa [#allocation3], 0  ;;  %s1913_s0 = inlined_call_operand.hbm [shape: f32[2,8,32], index: 0, kind: input, shape index: {}]   ;;  %s1914_s1 = inlined_call_operand.hbm [shape: f32[32,96], index: 1, kind: input, shape index: {}]   ;;  %s1915_s2 = inlined_call_operand.vmem [shape: f32[1,96], index: 2, kind: input, shape index: {}]   ;;  %s1916_s3 = inlined_call_operand.hbm [shape: f32[32,32], index: 3, kind: input, shape index: {}]   ;;  %s1917_s4 = inlined_call_operand.vmem [shape: f32[1,32], index: 4, kind: input, shape index: {}]   ;;  %s1918_s5 = inlined_call_operand.hbm [shape: f32[2,8,32], index: 5, kind: output, shape index: {}]  }
   0x1   :  { %12 = vsyncpa [#allocation3 + $0x1], 0 }
   0x2   :  { %13 = vsyncpa [#allocation6], 0 }
   0x3   :  { %14 = vsyncpa [#allocation4], 0 }
   0x4   :  { %16 = vsyncpa [#allocation4 + $0x1], 0  ;;  %s1654_s18 = smov 0   ;;  %s1656_s19 = smov 0  }
   0x5   :  { %s1658_s20 = smov 0   ;;  %s1660_s21 = smov 0  }
   0x6 LB: > { %s1675_s22 = sadd.s32 4294967295, %s1600_s21   ;;  %s1231_s23 = sadd.s32 4294967294, %s1600_s21   ;;  %s1600_s21 = sphi %s1660_s21, %s1940_s21   ;;  %s1596_s20 = sphi %s1658_s20, %s1939_s20   ;;  %s1592_s19 = sphi %s1656_s19, %s1938_s19   ;;  %s1588_s18 = sphi %s1654_s18, %s1937_s18  }
   0x7   : > { %p42_p0 = scmp.ne.s32.totalorder %s1592_s19, %s1588_s18  ;;  %p1919_p1 = scmp.eq.s32.totalorder %s1675_s22, 0 }
   0x8   : > { %p156_p3 = scmp.eq.s32.totalorder %s1231_s23, 1  ;;  %p1232_p5 = scmp.ge.s32.totalorder %s1600_s21, 1 }
   0x9   : > { %p1684_p4 = por %p1919_p1, %p42_p0  ;;  %p163_p7 = scmp.lt.s32.totalorder %s1600_s21, 3 }
   0xa   : > { %p1689_p6 = por %p156_p3, %p42_p0  ;;  %s1602_s27 = smov [#allocation5]  }
   0xb   : > { %s1923_s24 = scalar_select %p1684_p4, 1, 0 }
   0xc   : > { %s1924_s25 = scalar_select %p1689_p6, 1, 0 }
   0xd   : > { %p1694_p8 = pnand %p1232_p5, %p163_p7  ;;  %s175_s28 = sshll.u32 %s1602_s27, 4  ;;  %s176_s28 = int_to_ptr.vmem [resolvable:$true] %s175_s28 }
   0xe   : > { %s1603_s30 = smov [#allocation7]   ;;  %s1463_s7 = scalar_lea.vmem %s176_s28, 512 }
   0xf   : > { %s1925_s26 = scalar_select %p1694_p8, 1, 0 }
  0x10   : > { %p1363_p9 = pneg %p1694_p8  ;;  %s191_s6 = sshll.u32 %s1603_s30, 4  ;;  %s192_s6 = int_to_ptr.vmem [resolvable:$true] %s191_s6 }
  0x11   : > { %p1464_p13 = scmp.ne.s32.totalorder %s176_s28, %s1463_s7  ;;  %p1471_p5 = scmp.lt.s32.totalorder %s176_s28, %s176_s28 }
  0x12   : > { %p1703_p11 = pnand %p1363_p9, %p1919_p1  ;;  %p1472_p7 = scmp.lt.s32.totalorder %s1463_s7, %s1463_s7 }
  0x14   : > { %p1454_p12 = pneg %p1703_p11  ;;  %p1473_p10 = por %p1472_p7, %p1471_p5 }
  0x16   : > { %p1466_p0 = pnand %p1464_p13, %p1454_p12 }
  0x18   : > { %p1467_p3 = pneg %p1466_p0 }
  0x1a   : > { %p1474_p9 = pnand %p1473_p10, %p1467_p3 }
  0x1c   : > { %1477 = shalt.err (!%p1474_p9)
}
  0x1d   : > { %s1604_s8 = smov 128   ;;  %s1605_s9 = smov 8  }
  0x1e   : > { %1366 = dma.hbm_to_vmem [thread:$0]  (!%p1703_p11), %s1914_s1, 512, %s176_s28, [#allocation6], %s1604_s8, %s1604_s8, %s1605_s9  }
  0x1f   : > { %s1489_s12 = scalar_lea.vmem %s192_s6, 512  ;;  %p1497_p2 = scmp.lt.s32.totalorder %s192_s6, %s192_s6 }
  0x20   : > { %p1490_p1 = scmp.ne.s32.totalorder %s192_s6, %s1489_s12  ;;  %p1498_p6 = scmp.lt.s32.totalorder %s1489_s12, %s1489_s12 }
  0x22   : > { %p1492_p13 = pnand %p1490_p1, %p1454_p12  ;;  %p1499_p5 = por %p1498_p6, %p1497_p2 }
  0x24   : > { %p1493_p0 = pneg %p1492_p13 }
  0x26   : > { %p1500_p10 = pnand %p1499_p5, %p1493_p0 }
  0x28   : > { %1503 = shalt.err (!%p1500_p10)
}
  0x29   : > { %1369 = dma.hbm_to_vmem [thread:$0]  (!%p1703_p11), %s1916_s3, 512, %s192_s6, [#allocation6], %s1604_s8, %s1604_s8, %s1605_s9  }
  0x2a   : > { %s1726_s15 = sadd.s32 1, %s1600_s21   ;;  %s29_s16 = sadd.s32 1, %s1596_s20 }
  0x2b   : > { %s26_s17 = ssub.s32 %s1600_s21, %s1726_s15  ;;  %p36_p1 = scmp.ne.s32.totalorder %s1596_s20, %s1592_s19 }
  0x2c   : > { %p27_p2 = scmp.eq.s32.totalorder %s26_s17, 0  ;;  %p37_p6 = scmp.eq.s32.totalorder %s1600_s21, 0 }
  0x2d   : > { %p1927_p12 = scmp.eq.s32.totalorder %s1675_s22, 1  ;;  %p1380_p7 = scmp.lt.s32.totalorder %s1600_s21, 2 }
  0x2e   : > { %s1742_s27 = scalar_select %p27_p2, %s1596_s20, %s29_s16  }
  0x2f   : > { %p1736_p3 = por %p1927_p12, %p36_p1  ;;  %p38_p9 = por %p37_p6, %p36_p1 }
  0x30   : > { %s208_s28 = sand.u32 1, %s1596_s20   ;;  %s1237_s30 = sshll.u32 %s1600_s21, 7 }
  0x31   : > { %s1928_s23 = scalar_select %p1736_p3, 1, 0 }
  0x32   : > { %s1236_s29 = sshll.u32 %s208_s28, 3  ;;  %s1749_s8 = scalar_lea.hbm %s1913_s0, %s1237_s30 }
  0x33   : > { %s212_s9 = scalar_lea.vmem [#allocation2], %s1236_s29  ;;  %p1751_p11 = pnand %p1380_p7, %p38_p9 }
  0x34   : > { %s219_s10 = sshll.u32 %s212_s9, 4  ;;  %s209_s12 = scalar_lea.sflag [#allocation3], %s208_s28  ;;  %s220_s10 = int_to_ptr.vmem [resolvable:$true] %s219_s10 }
  0x35   : > { %s1504_s13 = scalar_lea.hbm %s1749_s8, 128  ;;  %p1506_p0 = pneg %p1751_p11 }
  0x36   : > { %p1505_p13 = scmp.ne.s32.totalorder %s1749_s8, %s1504_s13  ;;  %s1509_s17 = scalar_lea.hbm %s1913_s0, 256 }
  0x37   : > { %p1510_p1 = scmp.lt.s32.totalorder %s1749_s8, %s1913_s0  ;;  %p1511_p2 = scmp.lt.s32.totalorder %s1509_s17, %s1504_s13 }
  0x38   : > { %p1507_p5 = pnand %p1506_p0, %p1505_p13 }
  0x39   : > { %p1512_p6 = por %p1511_p2, %p1510_p1 }
  0x3a   : > { %p1508_p10 = pneg %p1507_p5 }
  0x3c   : > { %p1513_p12 = pnand %p1512_p6, %p1508_p10 }
  0x3e   : > { %1516 = shalt.err (!%p1513_p12)
}
  0x3f   : > { %s1517_s6 = scalar_lea.vmem %s220_s10, 128  ;;  %s1606_s28 = smov [#allocation2]  }
  0x40   : > { %p1518_p7 = scmp.ne.s32.totalorder %s220_s10, %s1517_s6  ;;  %s1522_s7 = sshll.u32 %s1606_s28, 4  ;;  %s1523_s7 = int_to_ptr.vmem [resolvable:$false] %s1522_s7 }
  0x41   : > { %s1524_s9 = scalar_lea.vmem %s1523_s7, 256  ;;  %p1525_p13 = scmp.lt.s32.totalorder %s220_s10, %s1523_s7 }
  0x42   : > { %p1520_p9 = pnand %p1518_p7, %p1506_p0  ;;  %p1526_p5 = scmp.lt.s32.totalorder %s1524_s9, %s1517_s6 }
  0x44   : > { %p1521_p3 = pneg %p1520_p9  ;;  %p1527_p4 = por %p1526_p5, %p1525_p13 }
  0x46   : > { %p1528_p8 = pnand %p1527_p4, %p1521_p3 }
  0x48   : > { %1531 = shalt.err (!%p1528_p8)
}
  0x49   : > { %1373 = dma.hbm_to_vmem [thread:$0]  (!%p1751_p11), %s1749_s8, 128, %s220_s10, %s209_s12  }
  0x4a   : > { %p1930_p10 = scmp.ne.s32.totalorder %s1925_s26, 0 }
  0x4b   : > { %s1772_s13 = sand.u32 (!%p1930_p10), 1, %s1592_s19   ;;  %p1931_p4 = scmp.ne.s32.totalorder (!%p1930_p10), %s1923_s24, 0 }
  0x4c   : > { %228 = sbr.rel (%p1930_p10) target bundleno = 1641 (0x669), region = 40  ;;  %s1239_s14 = sshll.u32 (!%p1930_p10), %s1772_s13, 3 }
  0x4d   : > { %s231_s16 = scalar_lea.sflag (!%p1930_p10), [#allocation3], %s1772_s13  ;;  %s234_s17 = scalar_lea.vmem (!%p1930_p10), [#allocation2], %s1239_s14 }
  0x51   : > { %1575 = dma.done.wait (%p1931_p4), %s231_s16, 128  }
  0x52   : > { %1577 = vsyncadd (%p1931_p4), %s231_s16, 4294967168  ;;  %p1932_p8 = scmp.eq.s32.totalorder %s1675_s22, 0 }
  0x54   : > { %1579 = dma.done.wait (%p1932_p8), [#allocation6], 1024   ;;  %p1933_p3 = pmov %p1932_p8 }
  0x55   : > { %v1607_v0 = vmov 0.0   ;;  %vm1608_vm0 = vmmov 0   ;;  %v273_v1 = vld [vmem:[#allocation5 + $0x18] sm:$0xff]  ;;  %v272_v2 = vld [vmem:[#allocation5 + $0x10] sm:$0xff]  ;;  %v271_v3 = vld [vmem:[#allocation5 + $0x8] sm:$0xff]  ;;  %vm281_vm1 = vcmask 261120   ;;  %v355_v19 = vlaneseq }
  0x56   : > { %1581 = vsyncadd (%p1933_p3), [#allocation6], 4294966272  ;;  %1289 = vmatprep.subr.mxu0 %v1607_v0  ;;  %1297 = vmatprep.mubr.msk.f32.mxu0 %vm1608_vm0, %v1607_v0  ;;  %v270_v4 = vld [vmem:[#allocation5] sm:$0xff]  ;;  %v269_v5 = vld [vmem:[%s234_s17] sm:$0xff]  ;;  %s1609_s8 = smov 64   ;;  %s1610_s10 = smov 96  }
  0x57   : > { %1300 = vmatprep.subr.mxu1 %v1607_v0  ;;  %1302 = vmatprep.mubr.msk.f32.mxu1 %vm1608_vm0, %v1607_v0  ;;  %v1243_v6 = vld [vmem:[%s1915_s2] ss:$0 sm:$0xff]  ;;  %s1611_s11 = smov 88   ;;  %s1612_s12 = smov 120   ;;  %vm364_vm2 = vcmask 64512   ;;  %v356_v20 = vshrl.u32 %v355_v19, 7 }
  0x58   : > { %1290 = vmatpush3.msra.mxu0 %v273_v1  ;;  %s1613_s30 = smov 80   ;;  %s1614_s29 = smov 112   ;;  %v358_v21 = vand.u32 127, %v355_v19  ;;  %vm1039_vm4 = vcmask 130048   ;;  %vm1041_vm5 = vcmask 195584  }
  0x59   : > { %1291 = vmatprep.subr.mxu0 %v1607_v0  ;;  %s1615_s6 = smov 72   ;;  %s1616_s28 = smov 104  }
  0x5a   : > { %1292 = vmatpush3.msra.mxu0 %v272_v2  ;;  %vm359_vm3 = vcmp.ge.s32.totalorder %v356_v20, %v358_v21  ;;  %s1617_s7 = smov 56   ;;  %s1618_s9 = smov 40   ;;  %v1046_v2 = vld [vmem:[#allocation7 + $0x18] sm:$0xff] }
  0x5b   : > { %1293 = vmatprep.subr.mxu0 %v1607_v0  ;;  %s1619_s16 = smov 48   ;;  %s1620_s17 = smov 8  }
  0x5c   : > { %1294 = vmatpush3.msra.mxu0 %v271_v3  ;;  %s1621_s24 = smov 16   ;;  %s1622_s26 = smov 24  }
  0x5d   : > { %1295 = vmatprep.subr.mxu0 %v1607_v0  ;;  %p1934_p0 = scmp.ne.s32.totalorder %s1928_s23, 0 }
  0x5e   : > { %1296 = vmatpush3.msra.mxu0 %v270_v4  ;;  %v1045_v4 = vld [vmem:[#allocation7 + $0x10] sm:$0xff] }
  0x5f   : > { %1298 = vmatmul.mubr.msk.f32.vlgmr.msra.gmra.mxu0 %vm281_vm1, %v269_v5  ;;  %1320 = vmatprep.subr.mxu0 %v1607_v0  ;;  %v1044_v5 = vld [vmem:[#allocation7 + $0x8] sm:$0xff] }
  0x60   : > { %1322 = vmatprep.mubr.msk.f32.mxu0 %vm1608_vm0, %v1607_v0 }
 0x11f   : > { %v351_v7 = vpop.f32.mrf.mxu0 }
 0x120   : > { %v1802_v8 = vadd.f32 %v1243_v6, %v351_v7  ;;  %v1043_v6 = vld [vmem:[#allocation7] sm:$0xff] }
 0x121   : > { %v1299_v9 = vpop.f32.mrf.mxu0 }
 0x122   : > { %450 = vrot.lane.b32.xlu1 %v1802_v8, %s1609_s8  ;;  %362 = vrot.lane.b32.xlu0 %v1802_v8, %s1610_s10  ;;  %v360_v10 = vmul.f32 0.35355338, %v1802_v8 }
 0x126   : > { %530 = vrot.lane.b32.xlu1 %v1802_v8, %s1611_s11  ;;  %s1260_s11 = sshll.u32 %s1675_s22, 7  ;;  %s1623_s22 = smov [#allocation8]  }
 0x12a   : > { %528 = vrot.lane.b32.xlu1 %v360_v10, %s1612_s12  ;;  %s268_s12 = scalar_lea.vmem [#allocation8], %s1239_s14  ;;  %s1536_s14 = sshll.u32 %s1623_s22, 4  ;;  %s1537_s14 = int_to_ptr.vmem [resolvable:$false] %s1536_s14 }
 0x12e   : > { %696 = vrot.lane.b32.xlu1 %v1802_v8, %s1613_s30  ;;  %s1142_s30 = sshll.u32 %s268_s12, 4  ;;  %s1143_s30 = int_to_ptr.vmem [resolvable:$true] %s1142_s30 }
 0x12f   : > { %p1539_p6 = scmp.lt.s32.totalorder %s1143_s30, %s1537_s14 }
 0x132   : > { %694 = vrot.lane.b32.xlu1 %v360_v10, %s1614_s29 }
 0x136   : > { %862 = vrot.lane.b32.xlu1 %v1802_v8, %s1615_s6 }
 0x13a   : > { %860 = vrot.lane.b32.xlu1 %v360_v10, %s1616_s28  ;;  %s1875_s28 = scalar_lea.hbm %s1918_s5, %s1260_s11 }
 0x194   : > { %v451_v11 = vpop.permute.xlu1 %450  ;;  %v363_v12 = vpop.permute.xlu0 %362 }
 0x195   : > { %1301 = vmatpush3.xpose.msk.msra.mxu1 %vm364_vm2, %v363_v12 }
 0x196   : > { %1305 = vmatprep.subr.mxu1 %v1607_v0 }
 0x198   : > { %v531_v13 = vpop.permute.xlu1 %530  ;;  %1303 = vmatmul.mubr.msk.f32.vlgmr.msra.gmra.mxu1 %vm364_vm2, %v360_v10 }
 0x199   : > { %1306 = vmatpush3.msra.mxu1 %v451_v11  ;;  %1307 = vmatprep.mubr.msk.f32.mxu1 %vm1608_vm0, %v1607_v0 }
 0x19a   : > { %1310 = vmatprep.subr.mxu1 %v1607_v0 }
 0x19c   : > { %v529_v14 = vpop.permute.xlu1 %528 }
 0x1a0   : > { %v697_v15 = vpop.permute.xlu1 %696 }
 0x1a1   : > { %1321 = vmatpush3.xpose.msk.msra.mxu0 %vm364_vm2, %v697_v15 }
 0x1a2   : > { %1330 = vmatprep.subr.mxu0 %v1607_v0 }
 0x1a4   : > { %v695_v16 = vpop.permute.xlu1 %694 }
 0x1a5   : > { %1323 = vmatmul.mubr.msk.f32.vlgmr.msra.gmra.mxu0 %vm364_vm2, %v695_v16 }
 0x1a6   : > { %1332 = vmatprep.mubr.msk.f32.mxu0 %vm1608_vm0, %v1607_v0 }
 0x1a8   : > { %v863_v17 = vpop.permute.xlu1 %862 }
 0x1a9   : > { %1331 = vmatpush3.xpose.msk.msra.mxu0 %vm364_vm2, %v863_v17 }
 0x1aa   : > { %1340 = vmatprep.subr.mxu0 %v1607_v0 }
 0x1ac   : > { %v861_v18 = vpop.permute.xlu1 %860 }
 0x1ad   : > { %1333 = vmatmul.mubr.msk.f32.vlgmr.msra.gmra.mxu0 %vm364_vm2, %v861_v18 }
 0x1ae   : > { %1348 = vmatprep.mubr.msk.f32.mxu0 %vm1608_vm0, %v1607_v0  ;;  %1341 = vmatpush3.msra.mxu0 %v1046_v2 }
 0x1af   : > { %1342 = vmatprep.subr.mxu0 %v1607_v0 }
 0x1b0   : > { %1343 = vmatpush3.msra.mxu0 %v1045_v4 }
 0x1b1   : > { %1344 = vmatprep.subr.mxu0 %v1607_v0 }
 0x1b2   : > { %1345 = vmatpush3.msra.mxu0 %v1044_v5 }
 0x1b3   : > { %1346 = vmatprep.subr.mxu0 %v1607_v0 }
 0x1b4   : > { %1347 = vmatpush3.msra.mxu0 %v1043_v6 }
 0x258   : > { %v436_v22 = vpop.f32.mrf.mxu1 }
 0x259   : > { %v440_v23 = vsel %vm359_vm3, %v436_v22, -100000.0 }
 0x25a   : > { %v1304_v24 = vpop.f32.mrf.mxu1  ;;  %v441_v25 = vsel %vm364_vm2, %v440_v23, -inf }
 0x25b   : > { %442 = vmax.xlane.f32.xlu0 %v441_v25 }
 0x265   : > { %v768_v26 = vpop.f32.mrf.mxu0 }
 0x266   : > { %v772_v30 = vsel %vm359_vm3, %v768_v26, -100000.0 }
 0x267   : > { %v1324_v27 = vpop.f32.mrf.mxu0  ;;  %v773_v31 = vsel %vm364_vm2, %v772_v30, -inf }
 0x268   : > { %v1257_v27 = vld [vmem:[%s1917_s4] ss:$0 sm:$0xff] }
 0x26d   : > { %v934_v28 = vpop.f32.mrf.mxu0 }
 0x26e   : > { %v938_v32 = vsel %vm359_vm3, %v934_v28, -100000.0 }
 0x26f   : > { %v1334_v29 = vpop.f32.mrf.mxu0  ;;  %v939_v33 = vsel %vm364_vm2, %v938_v32, -inf }
 0x271   : > { %616 = vrot.lane.b32.xlu0 %v1802_v8, %s1617_s7  ;;  %s1129_s7 = scalar_lea.sflag [#allocation4], %s1772_s13 }
 0x290   : > { %774 = vmax.xlane.f32.xlu0 %v773_v31 }
 0x294   : > { %940 = vmax.xlane.f32.xlu0 %v939_v33 }
 0x2aa   : > { %948 = vrot.lane.b32.xlu0 %v1802_v8, %s1618_s9  ;;  %s1532_s9 = scalar_lea.vmem %s1143_s30, 128 }
 0x2ab   : > { %p1533_p11 = scmp.ne.s32.totalorder %s1143_s30, %s1532_s9 }
 0x2ad   : > { %p1534_p1 = pnand %p1533_p11, %p1934_p0 }
 0x2af   : > { %p1535_p2 = pneg %p1534_p1 }
 0x2e4   : > { %v443_v34 = vpop.xlane.xlu0 %442 }
 0x2e5   : > { %v444_v35 = vsub.f32 %v440_v23, %v443_v34 }
 0x2e7   : > { %v445_v36 = vmul.f32 1.442695, %v444_v35 }
 0x2e8   : > { %v617_v38 = vpop.permute.xlu0 %616 }
 0x2e9   : > { %1436 = vpow2.f32 %v445_v36 }
 0x2f6   : > { %v1437_v37 = vpop.eup %1436 }
 0x2f7   : > { %1308 = vmatmul.mubr.msk.f32.vlgmr.msra.gmra.mxu1 %vm364_vm2, %v1437_v37  ;;  %v447_v62 = vsel %vm364_vm2, %v1437_v37, 0.0 }
 0x2f8   : > { %1311 = vmatpush3.xpose.msk.msra.mxu1 %vm364_vm2, %v531_v13  ;;  %1312 = vmatprep.mubr.msk.f32.mxu1 %vm1608_vm0, %v1607_v0 }
 0x2f9   : > { %1315 = vmatprep.subr.mxu1 %v1607_v0 }
 0x2fb   : > { %1313 = vmatmul.mubr.msk.f32.vlgmr.msra.gmra.mxu1 %vm364_vm2, %v529_v14 }
 0x2fc   : > { %1316 = vmatpush3.msra.mxu1 %v617_v38  ;;  %1317 = vmatprep.mubr.msk.f32.mxu1 %vm1608_vm0, %v1607_v0 }
 0x2fd   : > { %1325 = vmatprep.subr.mxu1 %v1607_v0 }
 0x319   : > { %v775_v45 = vpop.xlane.xlu0 %774 }
 0x31a   : > { %v776_v46 = vsub.f32 %v772_v30, %v775_v45 }
 0x31c   : > { %v777_v47 = vmul.f32 1.442695, %v776_v46 }
 0x31d   : > { %v941_v50 = vpop.xlane.xlu0 %940 }
 0x31e   : > { %1438 = vpow2.f32 %v777_v47  ;;  %v942_v51 = vsub.f32 %v938_v32, %v941_v50 }
 0x320   : > { %v943_v54 = vmul.f32 1.442695, %v942_v51 }
 0x321   : > { %v949_v60 = vpop.permute.xlu0 %948 }
 0x32b   : > { %v1439_v48 = vpop.eup %1438 }
 0x32c   : > { %v779_v49 = vsel %vm364_vm2, %v1439_v48, 0.0 }
 0x3b7   : > { %v1843_v39 = vpop.f32.mrf.mxu1 }
 0x3b9   : > { %v1309_v40 = vpop.f32.mrf.mxu1 }
 0x3bb   : > { %v602_v41 = vpop.f32.mrf.mxu1 }
 0x3bc   : > { %v606_v42 = vsel %vm359_vm3, %v602_v41, -100000.0 }
 0x3bd   : > { %v1314_v43 = vpop.f32.mrf.mxu1  ;;  %v607_v44 = vsel %vm364_vm2, %v606_v42, -inf }
 0x3be   : > { %608 = vmax.xlane.f32.xlu1 %v607_v44 }
 0x3cf   : > { %782 = vrot.lane.b32.xlu1 %v1802_v8, %s1619_s16  ;;  %s1538_s16 = scalar_lea.vmem %s1537_s14, 256 }
 0x3d0   : > { %p1540_p12 = scmp.lt.s32.totalorder %s1538_s16, %s1532_s9 }
 0x3d2   : > { %p1541_p7 = por %p1540_p12, %p1539_p6 }
 0x3d4   : > { %p1542_p9 = pnand %p1541_p7, %p1535_p2 }
 0x3f3   : > { %780 = vadd.xlane.f32.xlu1 %v779_v49 }
 0x447   : > { %v609_v52 = vpop.xlane.xlu1 %608 }
 0x448   : > { %v610_v53 = vsub.f32 %v606_v42, %v609_v52 }
 0x44a   : > { %v611_v55 = vmul.f32 1.442695, %v610_v53 }
 0x44b   : > { %v783_v57 = vpop.permute.xlu1 %782 }
 0x44c   : > { %1440 = vpow2.f32 %v611_v55 }
 0x44d   : > { %1442 = vpow2.f32 %v943_v54 }
 0x459   : > { %v1441_v56 = vpop.eup %1440 }
 0x45a   : > { %1318 = vmatmul.mubr.msk.f32.vlgmr.msra.gmra.mxu1 %vm364_vm2, %v1441_v56  ;;  %v613_v58 = vsel %vm364_vm2, %v1441_v56, 0.0  ;;  %v1443_v59 = vpop.eup %1442 }
 0x45b   : > { %1326 = vmatpush3.msra.mxu1 %v783_v57  ;;  %614 = vadd.xlane.f32.xlu0 %v613_v58  ;;  %v945_v61 = vsel %vm364_vm2, %v1443_v59, 0.0 }
 0x45c   : > { %1327 = vmatprep.mubr.msk.f32.mxu1 %vm1608_vm0, %v1607_v0  ;;  %1335 = vmatprep.subr.mxu1 %v1607_v0 }
 0x45e   : > { %1328 = vmatmul.mubr.msk.f32.vlgmr.msra.gmra.mxu1 %vm364_vm2, %v1439_v48 }
 0x45f   : > { %1336 = vmatpush3.msra.mxu1 %v949_v60  ;;  %946 = vadd.xlane.f32.xlu0 %v945_v61 }
 0x460   : > { %1337 = vmatprep.mubr.msk.f32.mxu1 %vm1608_vm0, %v1607_v0 }
 0x462   : > { %1338 = vmatmul.mubr.msk.f32.vlgmr.msra.gmra.mxu1 %vm364_vm2, %v1443_v59 }
 0x463   : > { %448 = vadd.xlane.f32.xlu0 %v447_v62 }
 0x47c   : > { %v781_v1 = vpop.xlane.xlu1 %780 }
 0x4e4   : > { %v615_v63 = vpop.xlane.xlu0 %614 }
 0x4e5   : > { %1444 = vrcp.f32 %v615_v63 }
 0x4e6   : > { %1446 = vrcp.f32 %v781_v1 }
 0x4e8   : > { %v947_v3 = vpop.xlane.xlu0 %946 }
 0x4e9   : > { %1448 = vrcp.f32 %v947_v3 }
 0x4ec   : > { %v449_v0 = vpop.xlane.xlu0 %448 }
 0x4ed   : > { %1450 = vrcp.f32 %v449_v0 }
 0x4f2   : > { %v1445_v7 = vpop.eup %1444 }
 0x4f3   : > { %v1447_v11 = vpop.eup %1446 }
 0x4f6   : > { %v1449_v15 = vpop.eup %1448 }
 0x4fa   : > { %v1451_v19 = vpop.eup %1450 }
 0x4fb   : > { %v527_v21 = vmul.f32 %v1451_v19, %v1843_v39 }
 0x51a   : > { %v688_v8 = vpop.f32.mrf.mxu1 }
 0x51b   : > { %v693_v9 = vmul.f32 %v1445_v7, %v688_v8 }
 0x51c   : > { %v1319_v10 = vpop.f32.mrf.mxu1 }
 0x51d   : > { %1027 = vrot.lane.b32.xlu0 %v693_v9, %s1620_s17 }
 0x51e   : > { %v854_v12 = vpop.f32.mrf.mxu1 }
 0x51f   : > { %v859_v13 = vmul.f32 %v1447_v11, %v854_v12 }
 0x520   : > { %v1329_v14 = vpop.f32.mrf.mxu1 }
 0x521   : > { %1031 = vrot.lane.b32.xlu1 %v859_v13, %s1621_s24 }
 0x522   : > { %v1020_v16 = vpop.f32.mrf.mxu1 }
 0x523   : > { %v1025_v17 = vmul.f32 %v1449_v15, %v1020_v16 }
 0x524   : > { %v1339_v18 = vpop.f32.mrf.mxu1 }
 0x525   : > { %1035 = vrot.lane.b32.xlu0 %v1025_v17, %s1622_s26 }
 0x58f   : > { %v1028_v20 = vpop.permute.xlu0 %1027 }
 0x590   : > { %v1038_v23 = vsel %vm364_vm2, %v527_v21, %v1028_v20 }
 0x593   : > { %v1032_v22 = vpop.permute.xlu1 %1031 }
 0x594   : > { %v1040_v24 = vsel %vm1039_vm4, %v1038_v23, %v1032_v22 }
 0x597   : > { %v1036_v25 = vpop.permute.xlu0 %1035 }
 0x598   : > { %v1042_v26 = vsel %vm1041_vm5, %v1040_v24, %v1036_v25 }
 0x599   : > { %1349 = vmatmul.mubr.msk.f32.vlgmr.msra.gmra.mxu0 %vm281_vm1, %v1042_v26 }
 0x659   : > { %v1123_v28 = vpop.f32.mrf.mxu0 }
 0x65a   : > { %v1124_v29 = vadd.f32 %v1257_v27, %v1123_v28 }
 0x65b   : > { %v1350_v30 = vpop.f32.mrf.mxu0 }
 0x65c   : > { %1127 = vst.msk [vmem:[%s268_s12] sm:$0xff] %vm281_vm1, %v1124_v29 }
 0x65d   : > { %1545 = shalt.err (!%p1542_p9)
}
 0x65e   : > { %s1546_s17 = scalar_lea.hbm %s1875_s28, 128  ;;  %s1550_s26 = scalar_lea.hbm %s1918_s5, 256 }
 0x65f   : > { %p1547_p13 = scmp.ne.s32.totalorder %s1875_s28, %s1546_s17  ;;  %p1551_p4 = scmp.lt.s32.totalorder %s1875_s28, %s1918_s5 }
 0x660   : > { %p1552_p8 = scmp.lt.s32.totalorder %s1550_s26, %s1546_s17 }
 0x661   : > { %p1548_p5 = pnand %p1547_p13, %p1934_p0 }
 0x662   : > { %p1553_p3 = por %p1552_p8, %p1551_p4 }
 0x663   : > { %p1549_p10 = pneg %p1548_p5 }
 0x665   : > { %p1554_p11 = pnand %p1553_p3, %p1549_p10 }
 0x667   : > { %1557 = shalt.err (!%p1554_p11)
}
 0x668   : > { %1361 = dma.vmem_to_hbm [thread:$0]  (%p1934_p0), %s1143_s30, 128, %s1875_s28, %s1129_s7  }
 0x669 PF: > { %s1154_s11 = sand.u32 1, %s1588_s18   ;;  %p1935_p1 = scmp.ne.s32.totalorder %s1924_s25, 0 }
 0x66a   : > { %p1936_p2 = scmp.ge.s32.totalorder %s1600_s21, 2  ;;  %s1155_s12 = scalar_lea.sflag [#allocation4], %s1154_s11 }
 0x66c   : > { %p1375_p6 = pnand %p1936_p2, %p1935_p1 }
 0x66e   : > { %p1376_p12 = pneg %p1375_p6 }
 0x670   : > { %1583 = dma.done.wait (%p1376_p12), %s1155_s12, 128  }
 0x671   : > { %1585 = vsyncadd (%p1376_p12), %s1155_s12, 4294967168  ;;  %p19_p7 = scmp.ge.s32.totalorder %s1726_s15, 4   ;;  %s1937_s18 = smov %s1592_s19 }
 0x672   : > { %s1938_s19 = smov %s1596_s20  ;;  %s1939_s20 = smov %s1742_s27 }
 0x673   : > { %s1940_s21 = smov %s1726_s15  ;;  %21 = sbr.rel (!%p19_p7) target bundleno = 6 (0x6), region = 93 }
 0x678   :  { %1160 = vsyncpa [#allocation3], 1 }
 0x679   :  { %1162 = vsyncpa [#allocation3 + $0x1], 1 }
 0x67a   :  { %1163 = vsyncpa [#allocation6], 1 }
 0x67b   :  { %1164 = vsyncpa [#allocation4], 1 }
 0x67c   :  { %1166 = vsyncpa [#allocation4 + $0x1], 1 }

</bundles_post_ra>
